<compile_context>
chip_gen: v7x
topology: tpu7x:2x2x1
jax: 0.10.0
libtpu: 0.0.40
codegen_flags: <defaults>
</compile_context>

<pallas_src>
from functools import partial

import jax
import jax.numpy as jnp
from jax import lax
from jax.experimental import pallas as pl
from jax.experimental.pallas import tpu as pltpu


CS = 8  # sublane chunk size: every intermediate is a full (8, 128) f32 vreg


# ----------------------------------------------------------------------------
# Kernel
# ----------------------------------------------------------------------------
def mps_kernel(theta_ref, x_ref, o_ref):
    """One batch tile.

    x_ref : (F, S, 128) f32 — batch spans (sublane, lane); x_ref[j] holds
            feature j for the S*128 batch elements of this grid step.
    o_ref : (S, 128) f32 — per-element prediction (lane- & sublane-dense store).
    theta_ref (SMEM, flat f32):
      [0:4]            first boundary node  A[p, c]   flat p*2 + c
      [4:8]            last  boundary node  A[a, p]   flat a*2 + p
      [8:8+8*(F-2)]    interior nodes, 8 coeffs each  flat a*4 + p*2 + c
      [OFF_C:OFF_C+4]  folded head matrix   C[a, c]   flat a*2 + c
      [OFF_C+4]        folded head bias     b_eff
    """
    F, S, _ = x_ref.shape
    n_chunks = S // CS
    P = (F + 1) // 2            # tensorkrowch MPSLayer default out_position
    nL = P - 1                  # interior input nodes left of the output node
    nR = F - 1 - P              # interior input nodes right of the output node
    OFF_MIDS = 8
    OFF_C = OFF_MIDS + 8 * (F - 2)
    n_theta = OFF_C + 5

    # Hoist all SMEM scalar reads out of the chunk loop (loop-invariant).
    th = [theta_ref[k] for k in range(n_theta)]

    def chunk(c, carry):
        s0 = pl.multiple_of(c * CS, CS)

        def xf(j):                                     # (CS, 128) feature slab
            return x_ref[j, pl.ds(s0, CS), :]

        # Poly embedding (degree 1: [1, x]) folded analytically into each node.
        x0, xF = xf(0), xf(F - 1)
        l0 = th[0] + x0 * th[2]                        # left boundary node
        l1 = th[1] + x0 * th[3]
        r0 = th[4] + xF * th[5]                        # right boundary node
        r1 = th[6] + xF * th[7]

        # Interleaved left / right sweeps: two independent 2-vector recurrences
        # (two dependency chains keep the VALU slots fed).
        for t in range(max(nL, nR)):
            if t < nL:                                 # left: features 1 .. P-1
                j = 1 + t
                b = OFF_MIDS + (j - 1) * 8
                xj = xf(j)
                m00 = th[b + 0] + xj * th[b + 2]
                m01 = th[b + 1] + xj * th[b + 3]
                m10 = th[b + 4] + xj * th[b + 6]
                m11 = th[b + 5] + xj * th[b + 7]
                l0, l1 = l0 * m00 + l1 * m10, l0 * m01 + l1 * m11
            if t < nR:                                 # right: features F-2 .. P
                j = F - 2 - t
                b = OFF_MIDS + (j - 1) * 8
                xj = xf(j)
                q00 = th[b + 0] + xj * th[b + 2]
                q01 = th[b + 1] + xj * th[b + 3]
                q10 = th[b + 4] + xj * th[b + 6]
                q11 = th[b + 5] + xj * th[b + 7]
                r0, r1 = q00 * r0 + q01 * r1, q10 * r0 + q11 * r1

        # Folded head: output-node tensor + Linear(8,24) + Linear(24,1)
        # collapse exactly (no nonlinearity) into 4 scalars + a bias.
        y = (th[OFF_C + 0] * (l0 * r0) + th[OFF_C + 1] * (l0 * r1)
             + th[OFF_C + 2] * (l1 * r0) + th[OFF_C + 3] * (l1 * r1)
             + th[OFF_C + 4])
        o_ref[pl.ds(s0, CS), :] = y
        return carry

    lax.fori_loop(0, n_chunks, chunk, 0, unroll=2 if n_chunks > 1 else 1)


# ----------------------------------------------------------------------------
# Parameter construction / packing
# ----------------------------------------------------------------------------
def init_params(key, F, in_dim=2, bond=2, out_dim=8, hidden=24, std=0.05):
    """Deterministic params. MPS tensors approximate tensorkrowch 'randn_eye'
    (identity structure + gaussian noise; std enlarged from 1e-9 so the noise
    is numerically visible)."""
    P = (F + 1) // 2                       # tensorkrowch default out_position
    keys = jax.random.split(key, F + 6)
    first = jax.random.normal(keys[0], (in_dim, bond)) * std + jnp.eye(in_dim, bond)
    last = jax.random.normal(keys[1], (bond, in_dim)) * std + jnp.eye(bond, in_dim)
    mids = []
    for j in range(1, F - 1):              # interior input nodes, features 1..F-2
        t = jax.random.normal(keys[1 + j], (bond, in_dim, bond)) * std
        t = t.at[:, 0, :].add(jnp.eye(bond))
        mids.append(t)
    tout = jax.random.normal(keys[F], (bond, out_dim, bond)) * std
    tout = tout + jnp.eye(bond)[:, None, :]
    # nn.Linear-style uniform init
    k1 = 1.0 / jnp.sqrt(8.0)
    k2 = 1.0 / jnp.sqrt(24.0)
    w1 = jax.random.uniform(keys[F + 1], (8, hidden), minval=-k1, maxval=k1)
    b1 = jax.random.uniform(keys[F + 2], (1, hidden), minval=-k1, maxval=k1)
    w2 = jax.random.uniform(keys[F + 3], (hidden, 1), minval=-k2, maxval=k2)
    b2 = jax.random.uniform(keys[F + 4], (1, 1), minval=-k2, maxval=k2)
    return dict(first=first, mids=mids, last=last, tout=tout,
                w1=w1, b1=b1, w2=w2, b2=b2, P=P)


def pack_params(p, F):
    """Flat SMEM scalar table:
       first(4) | last(4) | mids(8*(F-2)) | folded C(4) | folded bias(1)."""
    # Fold the purely linear head offline (exact):
    #   y = sum_o h_o (W1 @ w2)_o + (b1·w2 + b2)
    #     = sum_{a,c} l_a * C[a,c] * r_c + b_eff,  C[a,c] = sum_o tout[a,o,c](W1@w2)_o
    w_eff = (p["w1"] @ p["w2"]).reshape(-1)                       # (8,)
    C = jnp.einsum("aoc,o->ac", p["tout"], w_eff)                  # (2, 2)
    b_eff = p["b1"].reshape(-1) @ p["w2"].reshape(-1) + p["b2"].reshape(())
    theta = [p["first"].reshape(-1), p["last"].reshape(-1)]
    for j in range(1, F - 1):
        theta.append(p["mids"][j - 1].reshape(-1))                 # flat a*4+p*2+c
    theta.append(C.reshape(-1))                                    # flat a*2+c
    theta.append(b_eff.reshape(1))
    return jnp.concatenate(theta).astype(jnp.float32)


# ----------------------------------------------------------------------------
# Tiling / wrappers
# ----------------------------------------------------------------------------
def _cdiv(a, b):
    return -(-a // b)


def _round_up(a, m):
    return _cdiv(a, m) * m


def _pick_tiling(B, s_max):
    """Sublane-rows per grid step S (multiple of 8, <= s_max) and grid size nb.
    Keeps nb >= 2 when possible (v7x: feed both TensorCores) and balances S
    across steps to minimize batch padding."""
    g_min = _cdiv(B, 128)                          # 128-lane groups needed
    S = max(CS, min(s_max, _round_up(g_min, CS)))
    nb = _cdiv(g_min, S)
    if nb == 1 and S > CS:                         # split across 2 cores if possible
        nb = 2
    S = max(CS, _round_up(_cdiv(g_min, nb), CS))   # rebalance -> minimal padding
    return S, nb


def _mps_pallas(x_fm3, theta, S, nb):
    F, G, _ = x_fm3.shape                          # G == nb * S
    return pl.pallas_call(
        mps_kernel,
        out_shape=jax.ShapeDtypeStruct((G, 128), jnp.float32),
        grid=(nb,),
        in_specs=[
            pl.BlockSpec(memory_space=pltpu.MemorySpace.SMEM),   # theta scalars
            pl.BlockSpec((F, S, 128), lambda i: (0, i, 0)),      # batch tile
        ],
        out_specs=pl.BlockSpec((S, 128), lambda i: (i, 0)),
        compiler_params=pltpu.CompilerParams(
            dimension_semantics=("parallel",)),
    )(theta, x_fm3)


@partial(jax.jit, static_argnames=("s_max",))
def mps_forward(x, theta, s_max=256):
    """Module-faithful entry point: x is (B, F) exactly like the PyTorch model."""
    B, F = x.shape
    S, nb = _pick_tiling(B, s_max)
    B_pad = nb * S * 128
    x = x.astype(jnp.float32)
    if B_pad != B:                                  # pad batch tail with zeros
        x = jnp.pad(x, ((0, B_pad - B), (0, 0)))
    # TODO(synk): this transpose is one extra HBM read+write pass of x; callers
    # that can store x feature-major should use mps_forward_features_major.
    x_fm3 = jnp.transpose(x).reshape(F, nb * S, 128)
    out = _mps_pallas(x_fm3, theta, S, nb)
    return out.reshape(-1)[:B].reshape(B, 1)        # drop padded tail


@partial(jax.jit, static_argnames=("s_max",))
def mps_forward_features_major(x_fm, theta, s_max=256):
    """Transpose-free entry point: x_fm is (F, B) (features-major)."""
    F, B = x_fm.shape
    S, nb = _pick_tiling(B, s_max)
    B_pad = nb * S * 128
    x_fm = x_fm.astype(jnp.float32)
    if B_pad != B:
        x_fm = jnp.pad(x_fm, ((0, 0), (0, B_pad - B)))
    x_fm3 = x_fm.reshape(F, nb * S, 128)            # metadata-only reshape
    out = _mps_pallas(x_fm3, theta, S, nb)
    return out.reshape(-1)[:B].reshape(B, 1)


# ----------------------------------------------------------------------------
# Pure-JAX reference of the PyTorch/tensorkrowch forward (unfused head)
# ----------------------------------------------------------------------------
def reference_forward(x, p):
    F = x.shape[1]
    P = p["P"]
    emb = jnp.stack([jnp.ones_like(x), x], axis=-1)          # poly embedding, deg 1
    left = jnp.einsum("bp,pc->bc", emb[:, 0], p["first"])
    for j in range(1, P):
        M = jnp.einsum("bp,apc->bac", emb[:, j], p["mids"][j - 1])
        left = jnp.einsum("ba,bac->bc", left, M)
    right = jnp.einsum("ap,bp->ba", p["last"], emb[:, F - 1])
    for j in range(F - 2, P - 1, -1):
        M = jnp.einsum("bp,apc->bac", emb[:, j], p["mids"][j - 1])
        right = jnp.einsum("bac,bc->ba", M, right)
    h = jnp.einsum("ba,aoc,bc->bo", left, p["tout"], right)  # (B, 8)
    h = h @ p["w1"] + p["b1"].reshape(-1)
    y = (h * p["w2"].reshape(1, -1)).sum(-1, keepdims=True) + p["b2"].reshape(1, 1)
    return y


if __name__ == "__main__":
    F = 8            # input_size (number of CSV feature columns)
    key = jax.random.PRNGKey(0)
    kp, kx1, kx2, kx3 = jax.random.split(key, 4)

    params = init_params(kp, F)
    theta = pack_params(params, F)

    # B=8: tiny batch (pads up to one 8x128 chunk); B=200: non-trivial tail;
    # B=33000: multi-step grid (nb=2) + 17 inner chunks per step.
    for kx, B in ((kx1, 8), (kx2, 200), (kx3, 33000)):
        x = jax.random.normal(kx, (B, F), dtype=jnp.float32)
        out = jax.block_until_ready(mps_forward(x, theta))
        ref = reference_forward(x, params)
        assert out.shape == (B, 1)
        assert jnp.allclose(out, ref, atol=1e-4, rtol=1e-4), (B, out[:4], ref[:4])
        # transpose-free (features-major) path must match the standard path
        out_fm = jax.block_until_ready(mps_forward_features_major(x.T, theta))
        assert jnp.allclose(out_fm, out, atol=1e-6, rtol=1e-6)

    print("KERNEL_OK")
</pallas_src>

<mosaic_0001>
module attributes {stable_mosaic.version = 11 : i64} {
  func.func @mps_kernel(%arg0: i32, %arg1: memref<61xf32, #tpu.memory_space<smem>>, %arg2: memref<8x8x128xf32, #tpu.memory_space<vmem>>, %arg3: memref<8x128xf32, #tpu.memory_space<vmem>>) attributes {dimension_semantics = [#tpu.dimension_semantics<parallel>], iteration_bounds = array<i64: 1>, scalar_prefetch = 0 : i64, scratch_operands = 0 : i64, tpu.core_type = #tpu.core_type<tc>, window_params = [{transform_indices = @transform_0, window_bounds = array<i64: 61>}, {transform_indices = @transform_1, window_bounds = array<i64: 8, 8, 128>}, {transform_indices = @transform_2, window_bounds = array<i64: 8, 128>}]} {
    %c0 = arith.constant 0 : index
    %0 = memref.load %arg1[%c0] : memref<61xf32, #tpu.memory_space<smem>>
    %c1 = arith.constant 1 : index
    %1 = memref.load %arg1[%c1] : memref<61xf32, #tpu.memory_space<smem>>
    %c2 = arith.constant 2 : index
    %2 = memref.load %arg1[%c2] : memref<61xf32, #tpu.memory_space<smem>>
    %c3 = arith.constant 3 : index
    %3 = memref.load %arg1[%c3] : memref<61xf32, #tpu.memory_space<smem>>
    %c4 = arith.constant 4 : index
    %4 = memref.load %arg1[%c4] : memref<61xf32, #tpu.memory_space<smem>>
    %c5 = arith.constant 5 : index
    %5 = memref.load %arg1[%c5] : memref<61xf32, #tpu.memory_space<smem>>
    %c6 = arith.constant 6 : index
    %6 = memref.load %arg1[%c6] : memref<61xf32, #tpu.memory_space<smem>>
    %c7 = arith.constant 7 : index
    %7 = memref.load %arg1[%c7] : memref<61xf32, #tpu.memory_space<smem>>
    %c8 = arith.constant 8 : index
    %8 = memref.load %arg1[%c8] : memref<61xf32, #tpu.memory_space<smem>>
    %c9 = arith.constant 9 : index
    %9 = memref.load %arg1[%c9] : memref<61xf32, #tpu.memory_space<smem>>
    %c10 = arith.constant 10 : index
    %10 = memref.load %arg1[%c10] : memref<61xf32, #tpu.memory_space<smem>>
    %c11 = arith.constant 11 : index
    %11 = memref.load %arg1[%c11] : memref<61xf32, #tpu.memory_space<smem>>
    %c12 = arith.constant 12 : index
    %12 = memref.load %arg1[%c12] : memref<61xf32, #tpu.memory_space<smem>>
    %c13 = arith.constant 13 : index
    %13 = memref.load %arg1[%c13] : memref<61xf32, #tpu.memory_space<smem>>
    %c14 = arith.constant 14 : index
    %14 = memref.load %arg1[%c14] : memref<61xf32, #tpu.memory_space<smem>>
    %c15 = arith.constant 15 : index
    %15 = memref.load %arg1[%c15] : memref<61xf32, #tpu.memory_space<smem>>
    %c16 = arith.constant 16 : index
    %16 = memref.load %arg1[%c16] : memref<61xf32, #tpu.memory_space<smem>>
    %c17 = arith.constant 17 : index
    %17 = memref.load %arg1[%c17] : memref<61xf32, #tpu.memory_space<smem>>
    %c18 = arith.constant 18 : index
    %18 = memref.load %arg1[%c18] : memref<61xf32, #tpu.memory_space<smem>>
    %c19 = arith.constant 19 : index
    %19 = memref.load %arg1[%c19] : memref<61xf32, #tpu.memory_space<smem>>
    %c20 = arith.constant 20 : index
    %20 = memref.load %arg1[%c20] : memref<61xf32, #tpu.memory_space<smem>>
    %c21 = arith.constant 21 : index
    %21 = memref.load %arg1[%c21] : memref<61xf32, #tpu.memory_space<smem>>
    %c22 = arith.constant 22 : index
    %22 = memref.load %arg1[%c22] : memref<61xf32, #tpu.memory_space<smem>>
    %c23 = arith.constant 23 : index
    %23 = memref.load %arg1[%c23] : memref<61xf32, #tpu.memory_space<smem>>
    %c24 = arith.constant 24 : index
    %24 = memref.load %arg1[%c24] : memref<61xf32, #tpu.memory_space<smem>>
    %c25 = arith.constant 25 : index
    %25 = memref.load %arg1[%c25] : memref<61xf32, #tpu.memory_space<smem>>
    %c26 = arith.constant 26 : index
    %26 = memref.load %arg1[%c26] : memref<61xf32, #tpu.memory_space<smem>>
    %c27 = arith.constant 27 : index
    %27 = memref.load %arg1[%c27] : memref<61xf32, #tpu.memory_space<smem>>
    %c28 = arith.constant 28 : index
    %28 = memref.load %arg1[%c28] : memref<61xf32, #tpu.memory_space<smem>>
    %c29 = arith.constant 29 : index
    %29 = memref.load %arg1[%c29] : memref<61xf32, #tpu.memory_space<smem>>
    %c30 = arith.constant 30 : index
    %30 = memref.load %arg1[%c30] : memref<61xf32, #tpu.memory_space<smem>>
    %c31 = arith.constant 31 : index
    %31 = memref.load %arg1[%c31] : memref<61xf32, #tpu.memory_space<smem>>
    %c32 = arith.constant 32 : index
    %32 = memref.load %arg1[%c32] : memref<61xf32, #tpu.memory_space<smem>>
    %c33 = arith.constant 33 : index
    %33 = memref.load %arg1[%c33] : memref<61xf32, #tpu.memory_space<smem>>
    %c34 = arith.constant 34 : index
    %34 = memref.load %arg1[%c34] : memref<61xf32, #tpu.memory_space<smem>>
    %c35 = arith.constant 35 : index
    %35 = memref.load %arg1[%c35] : memref<61xf32, #tpu.memory_space<smem>>
    %c36 = arith.constant 36 : index
    %36 = memref.load %arg1[%c36] : memref<61xf32, #tpu.memory_space<smem>>
    %c37 = arith.constant 37 : index
    %37 = memref.load %arg1[%c37] : memref<61xf32, #tpu.memory_space<smem>>
    %c38 = arith.constant 38 : index
    %38 = memref.load %arg1[%c38] : memref<61xf32, #tpu.memory_space<smem>>
    %c39 = arith.constant 39 : index
    %39 = memref.load %arg1[%c39] : memref<61xf32, #tpu.memory_space<smem>>
    %c40 = arith.constant 40 : index
    %40 = memref.load %arg1[%c40] : memref<61xf32, #tpu.memory_space<smem>>
    %c41 = arith.constant 41 : index
    %41 = memref.load %arg1[%c41] : memref<61xf32, #tpu.memory_space<smem>>
    %c42 = arith.constant 42 : index
    %42 = memref.load %arg1[%c42] : memref<61xf32, #tpu.memory_space<smem>>
    %c43 = arith.constant 43 : index
    %43 = memref.load %arg1[%c43] : memref<61xf32, #tpu.memory_space<smem>>
    %c44 = arith.constant 44 : index
    %44 = memref.load %arg1[%c44] : memref<61xf32, #tpu.memory_space<smem>>
    %c45 = arith.constant 45 : index
    %45 = memref.load %arg1[%c45] : memref<61xf32, #tpu.memory_space<smem>>
    %c46 = arith.constant 46 : index
    %46 = memref.load %arg1[%c46] : memref<61xf32, #tpu.memory_space<smem>>
    %c47 = arith.constant 47 : index
    %47 = memref.load %arg1[%c47] : memref<61xf32, #tpu.memory_space<smem>>
    %c48 = arith.constant 48 : index
    %48 = memref.load %arg1[%c48] : memref<61xf32, #tpu.memory_space<smem>>
    %c49 = arith.constant 49 : index
    %49 = memref.load %arg1[%c49] : memref<61xf32, #tpu.memory_space<smem>>
    %c50 = arith.constant 50 : index
    %50 = memref.load %arg1[%c50] : memref<61xf32, #tpu.memory_space<smem>>
    %c51 = arith.constant 51 : index
    %51 = memref.load %arg1[%c51] : memref<61xf32, #tpu.memory_space<smem>>
    %c52 = arith.constant 52 : index
    %52 = memref.load %arg1[%c52] : memref<61xf32, #tpu.memory_space<smem>>
    %c53 = arith.constant 53 : index
    %53 = memref.load %arg1[%c53] : memref<61xf32, #tpu.memory_space<smem>>
    %c54 = arith.constant 54 : index
    %54 = memref.load %arg1[%c54] : memref<61xf32, #tpu.memory_space<smem>>
    %c55 = arith.constant 55 : index
    %55 = memref.load %arg1[%c55] : memref<61xf32, #tpu.memory_space<smem>>
    %c56 = arith.constant 56 : index
    %56 = memref.load %arg1[%c56] : memref<61xf32, #tpu.memory_space<smem>>
    %c57 = arith.constant 57 : index
    %57 = memref.load %arg1[%c57] : memref<61xf32, #tpu.memory_space<smem>>
    %c58 = arith.constant 58 : index
    %58 = memref.load %arg1[%c58] : memref<61xf32, #tpu.memory_space<smem>>
    %c59 = arith.constant 59 : index
    %59 = memref.load %arg1[%c59] : memref<61xf32, #tpu.memory_space<smem>>
    %c60 = arith.constant 60 : index
    %60 = memref.load %arg1[%c60] : memref<61xf32, #tpu.memory_space<smem>>
    %c0_i32 = arith.constant 0 : i32
    %c8_i32 = arith.constant 8 : i32
    %61 = arith.muli %c0_i32, %c8_i32 : i32
    %62 = tpu.assume_multiple %61, 8 : i32
    %c0_0 = arith.constant 0 : index
    %63 = arith.index_cast %62 : i32 to index
    %c0_1 = arith.constant 0 : index
    %64 = vector.load %arg2[%c0_0, %63, %c0_1] : memref<8x8x128xf32, #tpu.memory_space<vmem>>, vector<1x8x128xf32>
    %65 = vector.shape_cast %64 : vector<1x8x128xf32> to vector<8x128xf32>
    %c7_2 = arith.constant 7 : index
    %66 = arith.index_cast %62 : i32 to index
    %c0_3 = arith.constant 0 : index
    %67 = vector.load %arg2[%c7_2, %66, %c0_3] : memref<8x8x128xf32, #tpu.memory_space<vmem>>, vector<1x8x128xf32>
    %68 = vector.shape_cast %67 : vector<1x8x128xf32> to vector<8x128xf32>
    %69 = vector.broadcast %2 : f32 to vector<8x128xf32>
    %70 = arith.mulf %65, %69 : vector<8x128xf32>
    %71 = vector.broadcast %0 : f32 to vector<8x128xf32>
    %72 = arith.addf %71, %70 : vector<8x128xf32>
    %73 = vector.broadcast %3 : f32 to vector<8x128xf32>
    %74 = arith.mulf %65, %73 : vector<8x128xf32>
    %75 = vector.broadcast %1 : f32 to vector<8x128xf32>
    %76 = arith.addf %75, %74 : vector<8x128xf32>
    %77 = vector.broadcast %5 : f32 to vector<8x128xf32>
    %78 = arith.mulf %68, %77 : vector<8x128xf32>
    %79 = vector.broadcast %4 : f32 to vector<8x128xf32>
    %80 = arith.addf %79, %78 : vector<8x128xf32>
    %81 = vector.broadcast %7 : f32 to vector<8x128xf32>
    %82 = arith.mulf %68, %81 : vector<8x128xf32>
    %83 = vector.broadcast %6 : f32 to vector<8x128xf32>
    %84 = arith.addf %83, %82 : vector<8x128xf32>
    %c1_4 = arith.constant 1 : index
    %85 = arith.index_cast %62 : i32 to index
    %c0_5 = arith.constant 0 : index
    %86 = vector.load %arg2[%c1_4, %85, %c0_5] : memref<8x8x128xf32, #tpu.memory_space<vmem>>, vector<1x8x128xf32>
    %87 = vector.shape_cast %86 : vector<1x8x128xf32> to vector<8x128xf32>
    %88 = vector.broadcast %10 : f32 to vector<8x128xf32>
    %89 = arith.mulf %87, %88 : vector<8x128xf32>
    %90 = vector.broadcast %8 : f32 to vector<8x128xf32>
    %91 = arith.addf %90, %89 : vector<8x128xf32>
    %92 = vector.broadcast %11 : f32 to vector<8x128xf32>
    %93 = arith.mulf %87, %92 : vector<8x128xf32>
    %94 = vector.broadcast %9 : f32 to vector<8x128xf32>
    %95 = arith.addf %94, %93 : vector<8x128xf32>
    %96 = vector.broadcast %14 : f32 to vector<8x128xf32>
    %97 = arith.mulf %87, %96 : vector<8x128xf32>
    %98 = vector.broadcast %12 : f32 to vector<8x128xf32>
    %99 = arith.addf %98, %97 : vector<8x128xf32>
    %100 = vector.broadcast %15 : f32 to vector<8x128xf32>
    %101 = arith.mulf %87, %100 : vector<8x128xf32>
    %102 = vector.broadcast %13 : f32 to vector<8x128xf32>
    %103 = arith.addf %102, %101 : vector<8x128xf32>
    %104 = arith.mulf %72, %91 : vector<8x128xf32>
    %105 = arith.mulf %76, %99 : vector<8x128xf32>
    %106 = arith.addf %104, %105 : vector<8x128xf32>
    %107 = arith.mulf %72, %95 : vector<8x128xf32>
    %108 = arith.mulf %76, %103 : vector<8x128xf32>
    %109 = arith.addf %107, %108 : vector<8x128xf32>
    %c6_6 = arith.constant 6 : index
    %110 = arith.index_cast %62 : i32 to index
    %c0_7 = arith.constant 0 : index
    %111 = vector.load %arg2[%c6_6, %110, %c0_7] : memref<8x8x128xf32, #tpu.memory_space<vmem>>, vector<1x8x128xf32>
    %112 = vector.shape_cast %111 : vector<1x8x128xf32> to vector<8x128xf32>
    %113 = vector.broadcast %50 : f32 to vector<8x128xf32>
    %114 = arith.mulf %112, %113 : vector<8x128xf32>
    %115 = vector.broadcast %48 : f32 to vector<8x128xf32>
    %116 = arith.addf %115, %114 : vector<8x128xf32>
    %117 = vector.broadcast %51 : f32 to vector<8x128xf32>
    %118 = arith.mulf %112, %117 : vector<8x128xf32>
    %119 = vector.broadcast %49 : f32 to vector<8x128xf32>
    %120 = arith.addf %119, %118 : vector<8x128xf32>
    %121 = vector.broadcast %54 : f32 to vector<8x128xf32>
    %122 = arith.mulf %112, %121 : vector<8x128xf32>
    %123 = vector.broadcast %52 : f32 to vector<8x128xf32>
    %124 = arith.addf %123, %122 : vector<8x128xf32>
    %125 = vector.broadcast %55 : f32 to vector<8x128xf32>
    %126 = arith.mulf %112, %125 : vector<8x128xf32>
    %127 = vector.broadcast %53 : f32 to vector<8x128xf32>
    %128 = arith.addf %127, %126 : vector<8x128xf32>
    %129 = arith.mulf %116, %80 : vector<8x128xf32>
    %130 = arith.mulf %120, %84 : vector<8x128xf32>
    %131 = arith.addf %129, %130 : vector<8x128xf32>
    %132 = arith.mulf %124, %80 : vector<8x128xf32>
    %133 = arith.mulf %128, %84 : vector<8x128xf32>
    %134 = arith.addf %132, %133 : vector<8x128xf32>
    %c2_8 = arith.constant 2 : index
    %135 = arith.index_cast %62 : i32 to index
    %c0_9 = arith.constant 0 : index
    %136 = vector.load %arg2[%c2_8, %135, %c0_9] : memref<8x8x128xf32, #tpu.memory_space<vmem>>, vector<1x8x128xf32>
    %137 = vector.shape_cast %136 : vector<1x8x128xf32> to vector<8x128xf32>
    %138 = vector.broadcast %18 : f32 to vector<8x128xf32>
    %139 = arith.mulf %137, %138 : vector<8x128xf32>
    %140 = vector.broadcast %16 : f32 to vector<8x128xf32>
    %141 = arith.addf %140, %139 : vector<8x128xf32>
    %142 = vector.broadcast %19 : f32 to vector<8x128xf32>
    %143 = arith.mulf %137, %142 : vector<8x128xf32>
    %144 = vector.broadcast %17 : f32 to vector<8x128xf32>
    %145 = arith.addf %144, %143 : vector<8x128xf32>
    %146 = vector.broadcast %22 : f32 to vector<8x128xf32>
    %147 = arith.mulf %137, %146 : vector<8x128xf32>
    %148 = vector.broadcast %20 : f32 to vector<8x128xf32>
    %149 = arith.addf %148, %147 : vector<8x128xf32>
    %150 = vector.broadcast %23 : f32 to vector<8x128xf32>
    %151 = arith.mulf %137, %150 : vector<8x128xf32>
    %152 = vector.broadcast %21 : f32 to vector<8x128xf32>
    %153 = arith.addf %152, %151 : vector<8x128xf32>
    %154 = arith.mulf %106, %141 : vector<8x128xf32>
    %155 = arith.mulf %109, %149 : vector<8x128xf32>
    %156 = arith.addf %154, %155 : vector<8x128xf32>
    %157 = arith.mulf %106, %145 : vector<8x128xf32>
    %158 = arith.mulf %109, %153 : vector<8x128xf32>
    %159 = arith.addf %157, %158 : vector<8x128xf32>
    %c5_10 = arith.constant 5 : index
    %160 = arith.index_cast %62 : i32 to index
    %c0_11 = arith.constant 0 : index
    %161 = vector.load %arg2[%c5_10, %160, %c0_11] : memref<8x8x128xf32, #tpu.memory_space<vmem>>, vector<1x8x128xf32>
    %162 = vector.shape_cast %161 : vector<1x8x128xf32> to vector<8x128xf32>
    %163 = vector.broadcast %42 : f32 to vector<8x128xf32>
    %164 = arith.mulf %162, %163 : vector<8x128xf32>
    %165 = vector.broadcast %40 : f32 to vector<8x128xf32>
    %166 = arith.addf %165, %164 : vector<8x128xf32>
    %167 = vector.broadcast %43 : f32 to vector<8x128xf32>
    %168 = arith.mulf %162, %167 : vector<8x128xf32>
    %169 = vector.broadcast %41 : f32 to vector<8x128xf32>
    %170 = arith.addf %169, %168 : vector<8x128xf32>
    %171 = vector.broadcast %46 : f32 to vector<8x128xf32>
    %172 = arith.mulf %162, %171 : vector<8x128xf32>
    %173 = vector.broadcast %44 : f32 to vector<8x128xf32>
    %174 = arith.addf %173, %172 : vector<8x128xf32>
    %175 = vector.broadcast %47 : f32 to vector<8x128xf32>
    %176 = arith.mulf %162, %175 : vector<8x128xf32>
    %177 = vector.broadcast %45 : f32 to vector<8x128xf32>
    %178 = arith.addf %177, %176 : vector<8x128xf32>
    %179 = arith.mulf %166, %131 : vector<8x128xf32>
    %180 = arith.mulf %170, %134 : vector<8x128xf32>
    %181 = arith.addf %179, %180 : vector<8x128xf32>
    %182 = arith.mulf %174, %131 : vector<8x128xf32>
    %183 = arith.mulf %178, %134 : vector<8x128xf32>
    %184 = arith.addf %182, %183 : vector<8x128xf32>
    %c3_12 = arith.constant 3 : index
    %185 = arith.index_cast %62 : i32 to index
    %c0_13 = arith.constant 0 : index
    %186 = vector.load %arg2[%c3_12, %185, %c0_13] : memref<8x8x128xf32, #tpu.memory_space<vmem>>, vector<1x8x128xf32>
    %187 = vector.shape_cast %186 : vector<1x8x128xf32> to vector<8x128xf32>
    %188 = vector.broadcast %26 : f32 to vector<8x128xf32>
    %189 = arith.mulf %187, %188 : vector<8x128xf32>
    %190 = vector.broadcast %24 : f32 to vector<8x128xf32>
    %191 = arith.addf %190, %189 : vector<8x128xf32>
    %192 = vector.broadcast %27 : f32 to vector<8x128xf32>
    %193 = arith.mulf %187, %192 : vector<8x128xf32>
    %194 = vector.broadcast %25 : f32 to vector<8x128xf32>
    %195 = arith.addf %194, %193 : vector<8x128xf32>
    %196 = vector.broadcast %30 : f32 to vector<8x128xf32>
    %197 = arith.mulf %187, %196 : vector<8x128xf32>
    %198 = vector.broadcast %28 : f32 to vector<8x128xf32>
    %199 = arith.addf %198, %197 : vector<8x128xf32>
    %200 = vector.broadcast %31 : f32 to vector<8x128xf32>
    %201 = arith.mulf %187, %200 : vector<8x128xf32>
    %202 = vector.broadcast %29 : f32 to vector<8x128xf32>
    %203 = arith.addf %202, %201 : vector<8x128xf32>
    %204 = arith.mulf %156, %191 : vector<8x128xf32>
    %205 = arith.mulf %159, %199 : vector<8x128xf32>
    %206 = arith.addf %204, %205 : vector<8x128xf32>
    %207 = arith.mulf %156, %195 : vector<8x128xf32>
    %208 = arith.mulf %159, %203 : vector<8x128xf32>
    %209 = arith.addf %207, %208 : vector<8x128xf32>
    %c4_14 = arith.constant 4 : index
    %210 = arith.index_cast %62 : i32 to index
    %c0_15 = arith.constant 0 : index
    %211 = vector.load %arg2[%c4_14, %210, %c0_15] : memref<8x8x128xf32, #tpu.memory_space<vmem>>, vector<1x8x128xf32>
    %212 = vector.shape_cast %211 : vector<1x8x128xf32> to vector<8x128xf32>
    %213 = vector.broadcast %34 : f32 to vector<8x128xf32>
    %214 = arith.mulf %212, %213 : vector<8x128xf32>
    %215 = vector.broadcast %32 : f32 to vector<8x128xf32>
    %216 = arith.addf %215, %214 : vector<8x128xf32>
    %217 = vector.broadcast %35 : f32 to vector<8x128xf32>
    %218 = arith.mulf %212, %217 : vector<8x128xf32>
    %219 = vector.broadcast %33 : f32 to vector<8x128xf32>
    %220 = arith.addf %219, %218 : vector<8x128xf32>
    %221 = vector.broadcast %38 : f32 to vector<8x128xf32>
    %222 = arith.mulf %212, %221 : vector<8x128xf32>
    %223 = vector.broadcast %36 : f32 to vector<8x128xf32>
    %224 = arith.addf %223, %222 : vector<8x128xf32>
    %225 = vector.broadcast %39 : f32 to vector<8x128xf32>
    %226 = arith.mulf %212, %225 : vector<8x128xf32>
    %227 = vector.broadcast %37 : f32 to vector<8x128xf32>
    %228 = arith.addf %227, %226 : vector<8x128xf32>
    %229 = arith.mulf %216, %181 : vector<8x128xf32>
    %230 = arith.mulf %220, %184 : vector<8x128xf32>
    %231 = arith.addf %229, %230 : vector<8x128xf32>
    %232 = arith.mulf %224, %181 : vector<8x128xf32>
    %233 = arith.mulf %228, %184 : vector<8x128xf32>
    %234 = arith.addf %232, %233 : vector<8x128xf32>
    %235 = arith.mulf %206, %231 : vector<8x128xf32>
    %236 = vector.broadcast %56 : f32 to vector<8x128xf32>
    %237 = arith.mulf %236, %235 : vector<8x128xf32>
    %238 = arith.mulf %206, %234 : vector<8x128xf32>
    %239 = vector.broadcast %57 : f32 to vector<8x128xf32>
    %240 = arith.mulf %239, %238 : vector<8x128xf32>
    %241 = arith.addf %237, %240 : vector<8x128xf32>
    %242 = arith.mulf %209, %231 : vector<8x128xf32>
    %243 = vector.broadcast %58 : f32 to vector<8x128xf32>
    %244 = arith.mulf %243, %242 : vector<8x128xf32>
    %245 = arith.addf %241, %244 : vector<8x128xf32>
    %246 = arith.mulf %209, %234 : vector<8x128xf32>
    %247 = vector.broadcast %59 : f32 to vector<8x128xf32>
    %248 = arith.mulf %247, %246 : vector<8x128xf32>
    %249 = arith.addf %245, %248 : vector<8x128xf32>
    %250 = vector.broadcast %60 : f32 to vector<8x128xf32>
    %251 = arith.addf %249, %250 : vector<8x128xf32>
    %252 = arith.index_cast %62 : i32 to index
    %c0_16 = arith.constant 0 : index
    %253 = vector.load %arg3[%252, %c0_16] : memref<8x128xf32, #tpu.memory_space<vmem>>, vector<8x128xf32>
    tpu.vector_store %arg3[%252, %c0_16], %251 {strides = array<i32>} : memref<8x128xf32, #tpu.memory_space<vmem>>, vector<8x128xf32>,
    %c1_i32 = arith.constant 1 : i32
    return
  }
  func.func @transform_0(%arg0: i32) -> i32 {
    %c0_i32 = arith.constant 0 : i32
    %c0_i32_0 = arith.constant 0 : i32
    return %c0_i32 : i32
  }
  func.func @transform_1(%arg0: i32) -> (i32, i32, i32) {
    %c0_i32 = arith.constant 0 : i32
    %c0_i32_0 = arith.constant 0 : i32
    %c0_i32_1 = arith.constant 0 : i32
    return %c0_i32, %arg0, %c0_i32_0 : i32, i32, i32
  }
  func.func @transform_2(%arg0: i32) -> (i32, i32) {
    %c0_i32 = arith.constant 0 : i32
    %c0_i32_0 = arith.constant 0 : i32
    return %arg0, %c0_i32 : i32, i32
  }
}

</mosaic_0001>

<bundles_post_ra>
// kernel: mps_forward.1
= control target key start
LH: loop header
LB: loop body
LE: loop exit
PB: predicated region body
PF: predicated region fallthrough
CT: control target
= control target key end

     0   :  { %7 = vsyncpa [#allocation3], 0  ;;  %s599_s0 = inlined_call_operand.vmem [shape: f32[61], index: 0, kind: input, shape index: {}]   ;;  %s600_s1 = inlined_call_operand.vmem [shape: f32[8,8,128], index: 1, kind: input, shape index: {}]   ;;  %s601_s2 = inlined_call_operand.vmem [shape: f32[8,128], index: 2, kind: output, shape index: {}]  }
   0x1   :  { %s14_s11 = sshll.u32 %s599_s0, 4  ;;  %s15_s11 = int_to_ptr.vmem [resolvable:$true] %s14_s11 }
   0x2   :  { %s353_s12 = scalar_lea.vmem %s15_s11, 16  ;;  %p358_p1 = scmp.lt.s32.totalorder %s15_s11, %s15_s11 }
   0x3   :  { %p354_p0 = scmp.ne.s32.totalorder %s15_s11, %s353_s12  ;;  %p359_p2 = scmp.lt.s32.totalorder %s353_s12, %s353_s12 }
   0x5   :  { %p360_p3 = por %p359_p2, %p358_p1 }
   0x7   :  { %p361_p4 = pnand %p360_p3, %p354_p0 }
   0x9   :  { %364 = shalt.err (!%p361_p4)
}
   0xa   :  { %s367_s13 = smov [#allocation2]  }
   0xb   :  { %17 = dma.vmem_to_smem %s15_s11, 16, %s367_s13, [#allocation3]  }
   0xc   :  { %365 = dma.done.wait [#allocation3], 16  }
   0xd   :  { %366 = vsyncadd [#allocation3], 4294967280 }
   0xe   :  { %23 = sfence }
   0xf   :  { %s386_s14 = sld [smem:[#allocation2]]  ;;  %s388_s15 = sld [smem:[#allocation2 + $0x1]]  ;;  %v85_v0 = vld [vmem:[%s600_s1] sm:$0xff]  ;;  %v345_v1 = vld [vmem:[%s600_s1 + $0x38] sm:$0xff]  ;;  %v346_v10 = vld [vmem:[%s600_s1 + $0x8] sm:$0xff] }
  0x10   :  { %s286_s16 = sld [smem:[#allocation2 + $0x2]]  ;;  %s287_s0 = sld [smem:[#allocation2 + $0x3]]  ;;  %v348_v30 = vld [vmem:[%s600_s1 + $0x10] sm:$0xff]  ;;  %v350_v47 = vld [vmem:[%s600_s1 + $0x18] sm:$0xff] }
  0x11   :  { %s390_s17 = sld [smem:[#allocation2 + $0x4]]  ;;  %s289_s18 = sld [smem:[#allocation2 + $0x5]] }
  0x12   :  { %s392_s19 = sld [smem:[#allocation2 + $0x7]]  ;;  %s394_s20 = sld [smem:[#allocation2 + $0x8]] }
  0x13   :  { %s396_s21 = sld [smem:[#allocation2 + $0x9]]  ;;  %s398_s22 = sld [smem:[#allocation2 + $0xa]] }
  0x14   :  { %s400_s23 = sld [smem:[#allocation2 + $0xb]]  ;;  %s405_s26 = sld [smem:[#allocation2 + $0xc]] }
  0x15   :  { %s407_s27 = sld [smem:[#allocation2 + $0xd]]  ;;  %s409_s28 = sld [smem:[#allocation2 + $0xe]]  ;;  %v91_v3 = vstv %s386_s14  ;;  %v95_v8 = vstv %s388_s15 }
  0x16   :  { %s411_s29 = sld [smem:[#allocation2 + $0xf]]  ;;  %v89_v2 = vstv %s286_s16  ;;  %v93_v4 = vstv %s287_s0  ;;  %s417_s4 = sld [smem:[#allocation2 + $0x10]] }
  0x17   :  { %s419_s5 = sld [smem:[#allocation2 + $0x11]]  ;;  %v90_v5 = vmul.f32 %v89_v2, %v85_v0  ;;  %v94_v6 = vmul.f32 %v93_v4, %v85_v0  ;;  %v97_v7 = vstv %s289_s18  ;;  %s421_s6 = sld [smem:[#allocation2 + $0x12]]  ;;  %v99_v13 = vstv %s390_s17 }
  0x18   :  { %s423_s7 = sld [smem:[#allocation2 + $0x13]]  ;;  %v101_v9 = vstv %s392_s19  ;;  %s430_s10 = sld [smem:[#allocation2 + $0x14]]  ;;  %v434_v12 = vmul.f32 %v345_v1, %v97_v7  ;;  %v110_v15 = vstv %s394_s20 }
  0x19   :  { %s432_s11 = sld [smem:[#allocation2 + $0x15]]  ;;  %v92_v11 = vadd.f32 %v91_v3, %v90_v5  ;;  %s437_s12 = sld [smem:[#allocation2 + $0x16]]  ;;  %v108_v14 = vstv %s398_s22  ;;  %v114_v17 = vstv %s396_s21  ;;  %v96_v18 = vadd.f32 %v95_v8, %v94_v6 }
  0x1a   :  { %s439_s13 = sld [smem:[#allocation2 + $0x17]]  ;;  %v112_v16 = vstv %s400_s23  ;;  %s445_s14 = sld [smem:[#allocation2 + $0x18]]  ;;  %v447_v19 = vmul.f32 %v345_v1, %v101_v9  ;;  %v109_v20 = vmul.f32 %v346_v10, %v108_v14  ;;  %v118_v23 = vstv %s405_s26 }
  0x1b   :  { %v113_v21 = vmul.f32 %v346_v10, %v112_v16  ;;  %s449_s15 = sld [smem:[#allocation2 + $0x1a]]  ;;  %s451_s16 = sld [smem:[#allocation2 + $0x1b]]  ;;  %v116_v22 = vstv %s409_s28  ;;  %v122_v25 = vstv %s407_s27 }
  0x1c   :  { %v120_v24 = vstv %s411_s29  ;;  %s457_s0 = sld [smem:[#allocation2 + $0x6]]  ;;  %v111_v26 = vadd.f32 %v110_v15, %v109_v20  ;;  %v117_v28 = vmul.f32 %v346_v10, %v116_v22  ;;  %s462_s20 = sld [smem:[#allocation2 + $0x19]]  ;;  %v160_v32 = vstv %s417_s4  ;;  %v349_v15 = vld [vmem:[%s600_s1 + $0x28] sm:$0xff]  ;;  %v347_v22 = vld [vmem:[%s600_s1 + $0x30] sm:$0xff] }
  0x1d   :  { %v115_v27 = vadd.f32 %v114_v17, %v113_v21  ;;  %v121_v29 = vmul.f32 %v346_v10, %v120_v24  ;;  %s464_s21 = sld [smem:[#allocation2 + $0x1e]]  ;;  %v158_v31 = vstv %s421_s6  ;;  %v164_v34 = vstv %s419_s5  ;;  %s470_s22 = sld [smem:[#allocation2 + $0x1c]] }
  0x1e   :  { %v162_v33 = vstv %s423_s7  ;;  %v119_v35 = vadd.f32 %v118_v23, %v117_v28  ;;  %v124_v37 = vmul.f32 %v111_v26, %v92_v11  ;;  %s472_s23 = sld [smem:[#allocation2 + $0x1f]]  ;;  %v159_v39 = vmul.f32 %v348_v30, %v158_v31  ;;  %s480_s26 = sld [smem:[#allocation2 + $0x1d]] }
  0x1f   :  { %v123_v36 = vadd.f32 %v122_v25, %v121_v29  ;;  %v127_v38 = vmul.f32 %v115_v27, %v92_v11  ;;  %v163_v40 = vmul.f32 %v348_v30, %v162_v33  ;;  %v166_v41 = vstv %s437_s12  ;;  %s482_s27 = sld [smem:[#allocation2 + $0x22]]  ;;  %s485_s28 = sld [smem:[#allocation2 + $0x28]] }
  0x20   :  { %v168_v42 = vstv %s430_s10  ;;  %v125_v43 = vmul.f32 %v119_v35, %v96_v18  ;;  %v167_v45 = vmul.f32 %v348_v30, %v166_v41  ;;  %v170_v46 = vstv %s439_s13  ;;  %s487_s29 = sld [smem:[#allocation2 + $0x29]]  ;;  %s490_s30 = sld [smem:[#allocation2 + $0x2a]] }
  0x21   :  { %v128_v44 = vmul.f32 %v123_v36, %v96_v18  ;;  %v161_v48 = vadd.f32 %v160_v32, %v159_v39  ;;  %v165_v49 = vadd.f32 %v164_v34, %v163_v40  ;;  %v171_v50 = vmul.f32 %v348_v30, %v170_v46  ;;  %s492_s3 = sld [smem:[#allocation2 + $0x2b]]  ;;  %s496_s4 = sld [smem:[#allocation2 + $0x2c]] }
  0x22   :  { %v172_v51 = vstv %s432_s11  ;;  %v126_v52 = vadd.f32 %v125_v43, %v124_v37  ;;  %v169_v54 = vadd.f32 %v168_v42, %v167_v45  ;;  %v208_v55 = vstv %s449_s15  ;;  %s498_s5 = sld [smem:[#allocation2 + $0x2d]]  ;;  %s500_s6 = sld [smem:[#allocation2 + $0x2e]] }
  0x23   :  { %v129_v53 = vadd.f32 %v128_v44, %v127_v38  ;;  %v173_v56 = vadd.f32 %v172_v51, %v171_v50  ;;  %v209_v57 = vmul.f32 %v350_v47, %v208_v55  ;;  %v210_v58 = vstv %s445_s14  ;;  %s502_s7 = sld [smem:[#allocation2 + $0x2f]]  ;;  %s507_s8 = sld [smem:[#allocation2 + $0x30]] }
  0x24   :  { %v212_v59 = vstv %s451_s16  ;;  %v174_v60 = vmul.f32 %v161_v48, %v126_v52  ;;  %v177_v62 = vmul.f32 %v165_v49, %v126_v52  ;;  %v103_v0 = vstv %s457_s0  ;;  %s509_s9 = sld [smem:[#allocation2 + $0x31]]  ;;  %s511_s10 = sld [smem:[#allocation2 + $0x32]] }
  0x25   :  { %v175_v61 = vmul.f32 %v169_v54, %v129_v53  ;;  %v213_v63 = vmul.f32 %v350_v47, %v212_v59  ;;  %v178_v1 = vmul.f32 %v173_v56, %v129_v53  ;;  %v214_v2 = vstv %s462_s20  ;;  %s513_s11 = sld [smem:[#allocation2 + $0x33]]  ;;  %s517_s12 = sld [smem:[#allocation2 + $0x34]] }
  0x26   :  { %v216_v3 = vstv %s464_s21  ;;  %v211_v4 = vadd.f32 %v210_v58, %v209_v57  ;;  %v218_v8 = vstv %s470_s22  ;;  %v220_v9 = vstv %s472_s23  ;;  %s519_s13 = sld [smem:[#allocation2 + $0x35]]  ;;  %s530_s16 = sld [smem:[#allocation2 + $0x36]] }
  0x27   :  { %v217_v5 = vmul.f32 %v350_v47, %v216_v3  ;;  %v176_v6 = vadd.f32 %v175_v61, %v174_v60  ;;  %v215_v7 = vadd.f32 %v214_v2, %v213_v63  ;;  %v100_v10 = vadd.f32 %v99_v13, %v434_v12  ;;  %s532_s0 = sld [smem:[#allocation2 + $0x37]]  ;;  %s540_s17 = sld [smem:[#allocation2 + $0x20]] }
  0x28   :  { %v104_v11 = vadd.f32 %v103_v0, %v447_v19  ;;  %v525_v14 = vadd.f32 %v178_v1, %v177_v62  ;;  %v183_v16 = vstv %s490_s30  ;;  %v187_v17 = vstv %s492_s3  ;;  %s542_s18 = sld [smem:[#allocation2 + $0x23]]  ;;  %s553_s21 = sld [smem:[#allocation2 + $0x21]] }
  0x29   :  { %v222_v18 = vstv %s480_s26  ;;  %v233_v20 = vstv %s482_s27  ;;  %v185_v12 = vstv %s485_s28  ;;  %v189_v13 = vstv %s487_s29  ;;  %s555_s22 = sld [smem:[#allocation2 + $0x24]]  ;;  %s559_s23 = sld [smem:[#allocation2 + $0x26]] }
  0x2a   :  { %v219_v19 = vadd.f32 %v218_v8, %v217_v5  ;;  %v221_v21 = vmul.f32 %v350_v47, %v220_v9  ;;  %v191_v23 = vstv %s500_s6  ;;  %v195_v24 = vstv %s502_s7  ;;  %s561_s24 = sld [smem:[#allocation2 + $0x27]]  ;;  %s566_s25 = sld [smem:[#allocation2 + $0x25]]  ;;  %v351_v47 = vld [vmem:[%s600_s1 + $0x20] sm:$0xff] }
  0x2b   :  { %v549_v25 = vmul.f32 %v211_v4, %v176_v6  ;;  %v551_v26 = vmul.f32 %v215_v7, %v176_v6  ;;  %v135_v27 = vstv %s507_s8  ;;  %v184_v28 = vmul.f32 %v349_v15, %v183_v16  ;;  %s582_s1 = sld [smem:[#allocation2 + $0x38]]  ;;  %s585_s28 = sld [smem:[#allocation2 + $0x39]] }
  0x2c   :  { %v188_v29 = vmul.f32 %v349_v15, %v187_v17  ;;  %v193_v30 = vstv %s496_s4  ;;  %v133_v31 = vstv %s511_s10  ;;  %v137_v32 = vstv %s513_s11  ;;  %s587_s29 = sld [smem:[#allocation2 + $0x3a]]  ;;  %s343_s30 = sld [smem:[#allocation2 + $0x3b]] }
  0x2d   :  { %v139_v33 = vstv %s509_s9  ;;  %v192_v34 = vmul.f32 %v349_v15, %v191_v23  ;;  %v134_v35 = vmul.f32 %v347_v22, %v133_v31  ;;  %v138_v36 = vmul.f32 %v347_v22, %v137_v32  ;;  %s344_s3 = sld [smem:[#allocation2 + $0x3c]] }
  0x2e   :  { %v196_v37 = vmul.f32 %v349_v15, %v195_v24  ;;  %v197_v38 = vstv %s498_s5  ;;  %v141_v39 = vstv %s530_s16  ;;  %v143_v40 = vstv %s517_s12 }
  0x2f   :  { %v145_v41 = vstv %s532_s0  ;;  %v147_v42 = vstv %s519_s13  ;;  %v136_v43 = vadd.f32 %v135_v27, %v134_v35  ;;  %v140_v44 = vadd.f32 %v139_v33, %v138_v36 }
  0x30   :  { %v142_v45 = vmul.f32 %v347_v22, %v141_v39  ;;  %v146_v46 = vmul.f32 %v347_v22, %v145_v41  ;;  %v186_v48 = vadd.f32 %v185_v12, %v184_v28  ;;  %v190_v49 = vadd.f32 %v189_v13, %v188_v29 }
  0x31   :  { %v194_v50 = vadd.f32 %v193_v30, %v192_v34  ;;  %v223_v51 = vadd.f32 %v222_v18, %v221_v21  ;;  %v149_v54 = vmul.f32 %v136_v43, %v100_v10  ;;  %v150_v55 = vmul.f32 %v140_v44, %v104_v11 }
  0x32   :  { %v144_v52 = vadd.f32 %v143_v40, %v142_v45  ;;  %v148_v53 = vadd.f32 %v147_v42, %v146_v46  ;;  %v198_v56 = vadd.f32 %v197_v38, %v196_v37  ;;  %v234_v57 = vmul.f32 %v351_v47, %v233_v20 }
  0x33   :  { %v235_v58 = vstv %s540_s17  ;;  %v237_v59 = vstv %s542_s18  ;;  %v151_v60 = vadd.f32 %v150_v55, %v149_v54  ;;  %v239_v0 = vstv %s553_s21 }
  0x34   :  { %v152_v61 = vmul.f32 %v144_v52, %v100_v10  ;;  %v153_v62 = vmul.f32 %v148_v53, %v104_v11  ;;  %v238_v63 = vmul.f32 %v351_v47, %v237_v59  ;;  %v241_v1 = vstv %s559_s23 }
  0x35   :  { %v243_v2 = vstv %s555_s22  ;;  %v245_v3 = vstv %s561_s24  ;;  %v199_v5 = vmul.f32 %v186_v48, %v151_v60  ;;  %v202_v6 = vmul.f32 %v194_v50, %v151_v60 }
  0x36   :  { %v154_v4 = vadd.f32 %v153_v62, %v152_v61  ;;  %v247_v7 = vstv %s566_s25  ;;  %v225_v8 = vmul.f32 %v219_v19, %v525_v14  ;;  %v228_v9 = vmul.f32 %v223_v51, %v525_v14 }
  0x37   :  { %v242_v10 = vmul.f32 %v351_v47, %v241_v1  ;;  %v246_v11 = vmul.f32 %v351_v47, %v245_v3  ;;  %v236_v17 = vadd.f32 %v235_v58, %v234_v57  ;;  %v240_v18 = vadd.f32 %v239_v0, %v238_v63 }
  0x38   :  { %v200_v15 = vmul.f32 %v190_v49, %v154_v4  ;;  %v203_v16 = vmul.f32 %v198_v56, %v154_v4  ;;  %v226_v22 = vadd.f32 %v225_v8, %v549_v25  ;;  %v229_v19 = vadd.f32 %v228_v9, %v551_v26 }
  0x39   :  { %v244_v20 = vadd.f32 %v243_v2, %v242_v10  ;;  %v248_v12 = vadd.f32 %v247_v7, %v246_v11  ;;  %v256_v30 = vstv %s582_s1  ;;  %v259_v31 = vstv %s585_s28 }
  0x3a   :  { %v201_v13 = vadd.f32 %v200_v15, %v199_v5  ;;  %v204_v21 = vadd.f32 %v203_v16, %v202_v6  ;;  %v263_v32 = vstv %s587_s29  ;;  %v267_v37 = vstv %s343_s30 }
  0x3b   :  { %v270_v42 = vstv %s344_s3 }
  0x3c   :  { %v249_v23 = vmul.f32 %v236_v17, %v201_v13  ;;  %v250_v14 = vmul.f32 %v240_v18, %v204_v21  ;;  %v252_v24 = vmul.f32 %v244_v20, %v201_v13  ;;  %v253_v27 = vmul.f32 %v248_v12, %v204_v21 }
  0x3e   :  { %v251_v28 = vadd.f32 %v250_v14, %v249_v23  ;;  %v254_v29 = vadd.f32 %v253_v27, %v252_v24 }
  0x40   :  { %v255_v33 = vmul.f32 %v251_v28, %v226_v22  ;;  %v258_v34 = vmul.f32 %v254_v29, %v226_v22  ;;  %v262_v35 = vmul.f32 %v251_v28, %v229_v19  ;;  %v266_v36 = vmul.f32 %v254_v29, %v229_v19 }
  0x42   :  { %v257_v38 = vmul.f32 %v256_v30, %v255_v33  ;;  %v260_v39 = vmul.f32 %v259_v31, %v258_v34  ;;  %v264_v25 = vmul.f32 %v263_v32, %v262_v35  ;;  %v268_v26 = vmul.f32 %v267_v37, %v266_v36 }
  0x44   :  { %v261_v40 = vadd.f32 %v260_v39, %v257_v38 }
  0x46   :  { %v265_v41 = vadd.f32 %v264_v25, %v261_v40 }
  0x48   :  { %v269_v43 = vadd.f32 %v268_v26, %v265_v41 }
  0x4a   :  { %v271_v44 = vadd.f32 %v270_v42, %v269_v43 }
  0x4c   :  { %272 = vst [vmem:[%s601_s2] sm:$0xff] %v271_v44 }
  0x4d   :  { %277 = vsyncpa [#allocation3], 1 }

</bundles_post_ra>
